<compile_context>
chip_gen: v7x
topology: tpu7x:2x2x1
jax: 0.10.0
libtpu: 0.0.40
codegen_flags: <defaults>
</compile_context>

<pallas_src>
import functools
import math

import jax
import jax.numpy as jnp
import numpy as np
from jax.experimental import pallas as pl
from jax.experimental.pallas import tpu as pltpu


# ----------------------------------------------------------------------------
# Pallas kernel: one (batch b, pixel-tile t) grid step warps all L cavs onto the
# tile on the MXU, does an exact masked softmax over cavs, and writes cav-0's row.
# Grid = (B, P_pad // tn), both axes parallel (no reduction axis, no scratch).
# ----------------------------------------------------------------------------
def _att_warp_kernel(rl_ref, feats_ref, g_ref, out_ref, *, L, inv_sqrt_dim):
    b = pl.program_id(0)
    n_valid = rl_ref[b]                      # number of real cavs for this batch (>= 1)

    warped = []
    scores = []
    for l in range(L):                       # L is small (2-5): fully unrolled
        # (C, P_pad) bf16 @ (P_pad, tn) bf16 -> (C, tn) f32, single native MXU pass.
        w = jnp.dot(feats_ref[0, l], g_ref[0, l],
                    preferred_element_type=jnp.float32)
        warped.append(w)
        # Attention score of cav l against the cav-0 query (the only row kept).
        s = jnp.sum(warped[0] * w, axis=0, keepdims=True) * inv_sqrt_dim   # (1, tn)
        if l > 0:
            # Mask padded cavs out of the softmax (cav 0 is always valid).
            s = s + jnp.where(l < n_valid, 0.0, -1e30).astype(jnp.float32)
        scores.append(s)

    # Exact softmax over the (masked) cav axis.
    m = scores[0]
    for s in scores[1:]:
        m = jnp.maximum(m, s)
    ps = [jnp.exp(s - m) for s in scores]
    denom = ps[0]
    acc = ps[0] * warped[0]
    for p, w in zip(ps[1:], warped[1:]):
        denom = denom + p
        acc = acc + p * w

    # record_len >= 1 so denom >= 1; approx reciprocal runs on the EUP slot.
    out_ref[0] = (acc * pl.reciprocal(denom, approx=True)).astype(out_ref.dtype)


# ----------------------------------------------------------------------------
# On-device construction of the dense bilinear sampling matrices G such that
#   grid_sample(x, affine_grid(M), bilinear, zeros, align_corners=False)
#   == x.reshape(C, P) @ G[:P, :P]
# Only the (B, L, 2, 3) affine matrices cross the host boundary.
# ----------------------------------------------------------------------------
@functools.partial(jax.jit, static_argnums=(1, 2, 3))
def _build_warp_matrices(M_all, H, W, P_pad):
    M_all = M_all.astype(jnp.float32)                       # (B, L, 2, 3)
    B, L = M_all.shape[:2]
    P = H * W
    jj = jnp.arange(W, dtype=jnp.float32)
    ii = jnp.arange(H, dtype=jnp.float32)
    xn = jnp.broadcast_to(((2.0 * jj + 1.0 - W) / W)[None, :], (H, W)).reshape(-1)
    yn = jnp.broadcast_to(((2.0 * ii + 1.0 - H) / H)[:, None], (H, W)).reshape(-1)
    gx = (M_all[:, :, 0, 0, None] * xn + M_all[:, :, 0, 1, None] * yn
          + M_all[:, :, 0, 2, None])                        # (B, L, P)
    gy = (M_all[:, :, 1, 0, None] * xn + M_all[:, :, 1, 1, None] * yn
          + M_all[:, :, 1, 2, None])
    px = ((gx + 1.0) * W - 1.0) / 2.0                       # input pixel coords
    py = ((gy + 1.0) * H - 1.0) / 2.0
    x0 = jnp.floor(px)
    y0 = jnp.floor(py)
    wx1 = px - x0
    wx0 = 1.0 - wx1
    wy1 = py - y0
    wy0 = 1.0 - wy1

    bb = jnp.arange(B, dtype=jnp.int32)[:, None, None]
    ll = jnp.arange(L, dtype=jnp.int32)[None, :, None]
    pout = jnp.broadcast_to(jnp.arange(P, dtype=jnp.int32)[None, None, :], (B, L, P))

    G = jnp.zeros((B, L, P_pad, P_pad), jnp.float32)
    for xs, ys, w in ((x0, y0, wx0 * wy0), (x0 + 1.0, y0, wx1 * wy0),
                      (x0, y0 + 1.0, wx0 * wy1), (x0 + 1.0, y0 + 1.0, wx1 * wy1)):
        valid = (xs >= 0) & (xs <= W - 1) & (ys >= 0) & (ys <= H - 1)
        xi = jnp.clip(xs, 0, W - 1).astype(jnp.int32)
        yi = jnp.clip(ys, 0, H - 1).astype(jnp.int32)
        pin = yi * W + xi                                    # (B, L, P)
        G = G.at[bb, ll, pin, pout].add(jnp.where(valid, w, 0.0))
    return G.astype(jnp.bfloat16)


# ----------------------------------------------------------------------------
# Tile / VMEM sizing (per generation: a tile tuned on v6e/v5e's 128 MiB must not
# blow v7x's 64 MiB physical VMEM).
# ----------------------------------------------------------------------------
def _vmem_budget_bytes():
    try:
        phys = int(pltpu.get_tpu_info().vmem_capacity_bytes)
    except Exception:
        phys = 64 << 20                       # conservative (v7x-sized) fallback
    # ~55% of physical for the double-buffered pipeline blocks, capped.
    return min(int(phys * 0.55), 72 << 20), phys


def _block_bytes(P_pad, tn, L, C):
    # double-buffered G + double-buffered feats + double-buffered f32 output tile
    return 2 * (L * P_pad * tn * 2 + L * C * P_pad * 2 + C * tn * 4)


def _choose_tn(P_pad, L, C, budget_bytes):
    best = 128
    tn = 128
    while tn <= P_pad:
        if P_pad % tn == 0 and _block_bytes(P_pad, tn, L, C) <= budget_bytes:
            best = tn
        tn += 128
    return best


# ----------------------------------------------------------------------------
# Host-side glue.
# ----------------------------------------------------------------------------
def att_w_warp_pallas(xx, record_len, normalized_affine_matrix):
    """Equivalent of Att_w_Warp.forward. xx: (sum_N, C, H, W) NCHW."""
    sum_n, C, H, W = xx.shape
    B, L = normalized_affine_matrix.shape[:2]
    P = H * W
    P_pad = ((P + 127) // 128) * 128          # lane-dense output / G tiles

    rl = np.asarray(record_len, dtype=np.int32)
    assert rl.shape == (B,), "record_len must have one entry per batch element"
    assert np.all(rl >= 1), "Att_w_Warp requires record_len >= 1 per batch element"
    assert np.all(rl <= L) and int(rl.sum()) == sum_n

    budget, phys = _vmem_budget_bytes()
    tn = _choose_tn(P_pad, L, C, budget)
    # v7x megacore: keep at least 2 parallel work units so both TensorCores get work.
    if B * (P_pad // tn) < 2 and tn == P_pad and P_pad % 256 == 0:
        tn = P_pad // 2

    # Regroup the ragged cav features on device into (B, L, C, P_pad) bf16 (zero pad).
    cav_b = np.concatenate([np.full(int(rl[b]), b, np.int32) for b in range(B)])
    cav_l = np.concatenate([np.arange(int(rl[b]), dtype=np.int32) for b in range(B)])
    xx_flat = jnp.reshape(jnp.asarray(xx, jnp.float32), (sum_n, C, P))
    feats = jnp.zeros((B, L, C, P_pad), jnp.bfloat16)
    feats = feats.at[cav_b, cav_l, :, :P].set(xx_flat.astype(jnp.bfloat16))

    # Dense bilinear sampling matrices (built on device), bf16 in HBM.
    nam = jnp.asarray(normalized_affine_matrix, jnp.float32)
    G = _build_warp_matrices(nam[:, 0], H, W, P_pad)         # (B, L, P_pad, P_pad)

    rl_dev = jnp.asarray(rl, jnp.int32)
    kernel = functools.partial(_att_warp_kernel, L=L, inv_sqrt_dim=1.0 / math.sqrt(C))

    vmem_limit = int(min(max(32 << 20, _block_bytes(P_pad, tn, L, C) + (8 << 20)),
                         int(phys * 0.75)))

    out = pl.pallas_call(
        kernel,
        out_shape=jax.ShapeDtypeStruct((B, C, P_pad), jnp.float32),
        grid_spec=pltpu.PrefetchScalarGridSpec(
            num_scalar_prefetch=1,
            grid=(B, P_pad // tn),
            in_specs=[
                # All L cavs' features for batch b (re-used across pixel tiles).
                pl.BlockSpec((1, L, C, P_pad), lambda b, t, rl_ref: (b, 0, 0, 0)),
                # All L cavs' G columns for this output-pixel tile.
                pl.BlockSpec((1, L, P_pad, tn), lambda b, t, rl_ref: (b, 0, 0, t)),
            ],
            out_specs=pl.BlockSpec((1, C, tn), lambda b, t, rl_ref: (b, 0, t)),
        ),
        compiler_params=pltpu.CompilerParams(
            dimension_semantics=("parallel", "parallel"),
            vmem_limit_bytes=vmem_limit,
        ),
    )(rl_dev, feats, G)
    return out[:, :, :P].reshape(B, C, H, W)


# ----------------------------------------------------------------------------
# Pure-numpy reference (gather-based grid_sample + full attention), for checking.
# ----------------------------------------------------------------------------
def _grid_sample_ref(src, M):
    C, H, W = src.shape
    jj = np.arange(W, dtype=np.float64)
    ii = np.arange(H, dtype=np.float64)
    xn = (2 * jj + 1 - W) / W
    yn = (2 * ii + 1 - H) / H
    xn = np.broadcast_to(xn[None, :], (H, W))
    yn = np.broadcast_to(yn[:, None], (H, W))
    gx = M[0, 0] * xn + M[0, 1] * yn + M[0, 2]
    gy = M[1, 0] * xn + M[1, 1] * yn + M[1, 2]
    px = ((gx + 1) * W - 1) / 2
    py = ((gy + 1) * H - 1) / 2
    x0 = np.floor(px).astype(np.int64)
    y0 = np.floor(py).astype(np.int64)
    out = np.zeros((C, H, W), np.float64)
    for xi, yi, w in ((x0, y0, (x0 + 1 - px) * (y0 + 1 - py)),
                      (x0 + 1, y0, (px - x0) * (y0 + 1 - py)),
                      (x0, y0 + 1, (x0 + 1 - px) * (py - y0)),
                      (x0 + 1, y0 + 1, (px - x0) * (py - y0))):
        valid = (xi >= 0) & (xi < W) & (yi >= 0) & (yi < H)
        xc = np.clip(xi, 0, W - 1)
        yc = np.clip(yi, 0, H - 1)
        v = src[:, yc, xc]
        out += np.where(valid[None], v, 0.0) * w[None]
    return out


def ref_forward(xx, record_len, normalized_affine_matrix):
    xx = np.asarray(xx, np.float64)
    nam = np.asarray(normalized_affine_matrix, np.float64)
    sum_n, C, H, W = xx.shape
    B = nam.shape[0]
    rl = np.asarray(record_len)
    offsets = np.concatenate([[0], np.cumsum(rl)[:-1]])
    outs = []
    for b in range(B):
        N = int(rl[b])
        feats_b = xx[offsets[b]:offsets[b] + N]
        warped = np.stack([_grid_sample_ref(feats_b[n], nam[b, 0, n]) for n in range(N)])
        x = warped.reshape(N, C, H * W).transpose(2, 0, 1)       # (P, N, C)
        score = np.einsum('pnc,pmc->pnm', x, x) / math.sqrt(C)
        score = score - score.max(-1, keepdims=True)
        e = np.exp(score)
        attn = e / e.sum(-1, keepdims=True)
        ctx = np.einsum('pnm,pmc->pnc', attn, x)                 # (P, N, C)
        h = ctx.transpose(1, 2, 0).reshape(N, C, H, W)[0]
        outs.append(h)
    return np.stack(outs)


if __name__ == "__main__":
    # ScaledDotProductAttention(feature_dims) has no learnable parameters
    # (only the 1/sqrt(feature_dims) scale), so there are no weights to initialize.
    key = jax.random.PRNGKey(0)
    B, C, H, W = 2, 4, 16, 16
    record_len = np.array([2, 3], dtype=np.int32)
    L = int(record_len.max())
    sum_n = int(record_len.sum())

    k1, k2 = jax.random.split(key)
    xx = jax.random.normal(k1, (sum_n, C, H, W), dtype=jnp.float32)
    # Make the features exactly bf16-representable so the check isolates kernel error
    # (the kernel stores features/warp matrices in bf16 and accumulates in f32).
    xx = xx.astype(jnp.bfloat16).astype(jnp.float32)
    eye = jnp.broadcast_to(
        jnp.array([[1.0, 0.0, 0.0], [0.0, 1.0, 0.0]], jnp.float32), (B, L, L, 2, 3)
    )
    noise = 0.05 * jax.random.normal(k2, (B, L, L, 2, 3), dtype=jnp.float32)
    normalized_affine_matrix = eye + noise

    out = att_w_warp_pallas(xx, record_len, normalized_affine_matrix)
    out = jax.block_until_ready(out)

    ref = ref_forward(xx, record_len, normalized_affine_matrix)
    assert out.shape == (B, C, H, W)
    # bf16 feats / G streaming + f32 MXU accumulation + approx reciprocal -> ~1e-2
    # worst-case error vs the f64 reference; 5e-2 tolerance as before.
    np.testing.assert_allclose(np.asarray(out), ref, atol=5e-2, rtol=5e-2)
    print("KERNEL_OK")
</pallas_src>

<mosaic_0001>
module attributes {stable_mosaic.version = 11 : i64} {
  func.func private @main(%arg0: i32) attributes {dimension_semantics = [#tpu.dimension_semantics<core_parallel>], iteration_bounds = array<i64: 2>, tpu.core_type = #tpu.core_type<sc_scalar_subcore>, window_params = []} {
    return
  }
}

module attributes {stable_mosaic.version = 11 : i64} {
  func.func private @main(%arg0: i32) attributes {dimension_semantics = [#tpu.dimension_semantics<core_parallel>], iteration_bounds = array<i64: 2>, tpu.core_type = #tpu.core_type<sc_scalar_subcore>, window_params = []} {
    return
  }
}

</mosaic_0001>

<bundles_post_ra>
// kernel: mul.67
= control target key start
LH: loop header
LB: loop body
LE: loop exit
PB: predicated region body
PF: predicated region fallthrough
CT: control target
= control target key end

     0   :  { %s7_s6 = smov 3  ;;  %s21_s9 = smov 3  ;;  %vm4_vm0 = vcmask 130048   ;;  %vm11_vm1 = vcmask 1048448   ;;  %vm18_vm2 = vcmask 917248   ;;  %vm25_vm3 = vcmask 786048   ;;  %s119_s0 = inlined_call_operand.vmem [shape: f32[16,16], index: 0, kind: input, shape index: {}]   ;;  %s120_s1 = inlined_call_operand.vmem [shape: f32[256], index: 1, kind: output, shape index: {}]  }
   0x1   :  { %v61_v0 = vld [vmem:[%s119_s0 + $0x7] ss:$8 sm:%s7_s6]   ;;  %s75_s10 = smov 112   ;;  %v63_v1 = vld [vmem:[%s119_s0 + $0x5] ss:$8 sm:%s21_s9]   ;;  %s14_s13 = smov 3 }
   0x2   :  { %9 = vrot.lane.b32.xlu0 %v61_v0, %s75_s10  ;;  %s76_s14 = smov 80   ;;  %v62_v2 = vld [vmem:[%s119_s0 + $0x6] ss:$8 sm:%s14_s13]   ;;  %s28_s17 = smov 3  ;;  %vm32_vm4 = vcmask 654848   ;;  %vm39_vm5 = vcmask 523648  }
   0x3   :  { %23 = vrot.lane.b32.xlu1 %v63_v1, %s76_s14  ;;  %v64_v3 = vld [vmem:[%s119_s0 + $0x4] ss:$8 sm:%s28_s17]   ;;  %s35_s20 = smov 3  ;;  %s42_s21 = smov 3  ;;  %vm46_vm6 = vcmask 392448   ;;  %vm53_vm7 = vcmask 261248  }
   0x4   :  { %s77_s22 = smov 96   ;;  %s78_s23 = smov 64   ;;  %v65_v4 = vld [vmem:[%s119_s0 + $0x3] ss:$8 sm:%s35_s20]   ;;  %v66_v5 = vld [vmem:[%s119_s0 + $0x2] ss:$8 sm:%s42_s21]  }
   0x5   :  { %s2_s26 = smov 3  ;;  %s49_s29 = smov 3 }
   0x6   :  { %16 = vrot.lane.b32.xlu0 %v62_v2, %s77_s22  ;;  %v3_v6 = vld [vmem:[%s119_s0] ss:$8 sm:%s2_s26]   ;;  %s79_s3 = smov 48   ;;  %s80_s4 = smov 32  }
   0x7   :  { %30 = vrot.lane.b32.xlu1 %v64_v3, %s78_s23  ;;  %5 = vst.msk [vmem:[#allocation0] sm:$0x3] %vm4_vm0, %v3_v6   ;;  %v67_v7 = vld [vmem:[%s119_s0 + $0x1] ss:$8 sm:%s49_s29]   ;;  %s81_s0 = smov 16  }
   0xa   :  { %37 = vrot.lane.b32.xlu0 %v65_v4, %s79_s3 }
   0xb   :  { %44 = vrot.lane.b32.xlu1 %v66_v5, %s80_s4 }
   0xe   :  { %51 = vrot.lane.b32.xlu0 %v67_v7, %s81_s0 }
  0x74   :  { %v10_v8 = vpop.permute.xlu0 %9  }
  0x75   :  { %12 = vst.msk [vmem:[#allocation0] sm:$0x3] %vm11_vm1, %v10_v8   ;;  %v24_v9 = vpop.permute.xlu1 %23  }
  0x78   :  { %v17_v10 = vpop.permute.xlu0 %16  }
  0x79   :  { %19 = vst.msk [vmem:[#allocation0] sm:$0x3] %vm18_vm2, %v17_v10   ;;  %v31_v11 = vpop.permute.xlu1 %30  }
  0x7a   :  { %26 = vst.msk [vmem:[#allocation0] sm:$0x3] %vm25_vm3, %v24_v9  }
  0x7b   :  { %33 = vst.msk [vmem:[#allocation0] sm:$0x3] %vm32_vm4, %v31_v11  }
  0x7c   :  { %v38_v12 = vpop.permute.xlu0 %37  }
  0x7d   :  { %40 = vst.msk [vmem:[#allocation0] sm:$0x3] %vm39_vm5, %v38_v12   ;;  %v45_v13 = vpop.permute.xlu1 %44  }
  0x7e   :  { %47 = vst.msk [vmem:[#allocation0] sm:$0x3] %vm46_vm6, %v45_v13  }
  0x80   :  { %v52_v14 = vpop.permute.xlu0 %51  }
  0x81   :  { %54 = vst.msk [vmem:[#allocation0] sm:$0x3] %vm53_vm7, %v52_v14  }
  0x88   :  { %v58_v15 = vld [vmem:[#allocation0] sm:$0x3] }
  0x89   :  { %60 = vst [vmem:[%s120_s1] sm:$0x3] %v58_v15 }

</bundles_post_ra>
